<compile_context>
chip_gen: v6e
topology: v6e:2x2x1
jax: 0.10.0
libtpu: 0.0.40
codegen_flags: <defaults>
</compile_context>

<pallas_src>
import functools

import jax
import jax.numpy as jnp
from jax.experimental import pallas as pl
from jax.experimental.pallas import tpu as pltpu


def _ce_label_smooth_kernel(class_ref, *refs, label_smoothing, n_classes,
                            has_weight):
    if has_weight:
        lo_ref, hi_ref, pred_ref, tgt_ref, out_ref = refs
        lo = lo_ref[...]                                  # (1, C) f32
        hi = hi_ref[...]                                  # (1, C) f32
    else:
        pred_ref, tgt_ref, out_ref = refs
        lo = label_smoothing / n_classes                  # scalar constants
        hi = lo + (1.0 - label_smoothing)

    pred = pred_ref[...].astype(jnp.float32)              # (TM, C) f32 compute

    # Row-wise max-shifted log-sum-exp (exp on EUP, reductions on XLU).
    m = jnp.max(pred, axis=1, keepdims=True)              # (TM, 1)
    shifted = pred - m                                    # (TM, C)
    lse = jnp.log(jnp.sum(jnp.exp(shifted), axis=1, keepdims=True))  # (TM, 1)

    # Smoothed (optionally class-weighted) target coefficients via a single
    # select against the resident class-id row.
    is_tgt = class_ref[...] == tgt_ref[...]               # (1,C)==(TM,1) -> (TM,C)
    coef = jnp.where(is_tgt, hi, lo)                      # (TM, C)

    s1 = jnp.sum(coef * shifted, axis=1, keepdims=True)   # (TM, 1)
    if has_weight:
        s2 = jnp.sum(coef, axis=1, keepdims=True)         # (TM, 1)
        out = s1 - lse * s2
    else:
        out = s1 - lse   # sum(coef) == (C-1)*ls/C + ls/C + (1-ls) == 1 exactly

    # Signed per-row contribution (<= 0); the single negate and the 1/N mean
    # are done once in plain JAX outside the kernel.
    # TODO(synk): a lane-dense (1, TM) output layout would avoid the masked
    # (TM, 1) column stores, but needs a sublane->lane relayout in-kernel;
    # the writeback bytes here are tiny, so it is left as a follow-up.
    out_ref[...] = out


def _pick_block_rows(n, c, itemsize, block_rows=None,
                     vmem_budget=12 << 20, max_rows=1024):
    if block_rows is not None:
        return max(8, (int(block_rows) // 8) * 8)
    # Double-buffered native-dtype input tile + ~3 live f32 (TM, C) temporaries
    # (fused kernel: shifted / exp / coef*shifted).  12 MiB keeps the pick
    # valid even against v5e's small default scoped-VMEM limit.
    bytes_per_row = (2 * itemsize + 3 * 4) * max(c, 1)
    tm = vmem_budget // bytes_per_row
    tm = max(8, min(max_rows, (tm // 8) * 8))
    # Ensure >= ~4 grid steps so v7x megacore gets >= 2 blocks per TensorCore
    # and the BlockSpec pipeline has something to overlap.
    quarter = max(8, ((n // 4) // 8) * 8)
    tm = min(tm, quarter)
    # No point exceeding the (8-rounded) batch size.
    n8 = ((n + 7) // 8) * 8
    return min(tm, n8)


def cross_entropy_label_smooth(pred, target, label_smoothing, weight=None,
                               block_rows=None):
    """pred: (N, C) float (f32 or bf16), target: (N,) int, weight: optional (C,)."""
    n, c = pred.shape
    ls = float(label_smoothing)
    has_weight = weight is not None

    target2d = jnp.asarray(target, jnp.int32).reshape(n, 1)
    class_row = jax.lax.broadcasted_iota(jnp.int32, (1, c), 1)

    itemsize = jnp.dtype(pred.dtype).itemsize
    tm = _pick_block_rows(n, c, itemsize, block_rows)
    num_blocks = pl.cdiv(n, tm)        # ragged last block handled by Pallas

    kernel = functools.partial(
        _ce_label_smooth_kernel,
        label_smoothing=ls, n_classes=c, has_weight=has_weight)

    # Deeper buffering only when the streamed tile is small and there are
    # enough grid steps for per-step DMA-issue latency to be exposed.
    pred_tile_bytes = tm * c * itemsize
    if pred_tile_bytes < (1 << 20) and num_blocks >= 8:
        pred_spec = pl.BlockSpec((tm, c), lambda i: (i, 0),
                                 pipeline_mode=pl.Buffered(3))
    else:
        pred_spec = pl.BlockSpec((tm, c), lambda i: (i, 0))

    in_specs = [pl.BlockSpec((1, c), lambda i: (0, 0))]   # class ids, resident
    inputs = [class_row]
    if has_weight:
        w = jnp.asarray(weight, jnp.float32).reshape(1, c)
        row_lo = w * (ls / c)
        row_hi = w * (ls / c + (1.0 - ls))
        in_specs += [pl.BlockSpec((1, c), lambda i: (0, 0)),   # row_lo, resident
                     pl.BlockSpec((1, c), lambda i: (0, 0))]   # row_hi, resident
        inputs += [row_lo, row_hi]
    in_specs += [pred_spec,                                    # pred tile (native dtype)
                 pl.BlockSpec((tm, 1), lambda i: (i, 0))]      # target rows
    inputs += [pred, target2d]

    # TODO(synk): for vocab-scale C where even a TM=8 row tile stresses VMEM,
    # add a second "arbitrary" grid axis over C with a streaming log-sum-exp.
    # TODO(synk): when production C << 128, pack k rows into the lane dim
    # wrapper-side to recover lane utilization (k*C lanes per vreg).
    per_row = pl.pallas_call(
        kernel,
        out_shape=jax.ShapeDtypeStruct((n, 1), jnp.float32),
        grid=(num_blocks,),
        in_specs=in_specs,
        out_specs=pl.BlockSpec((tm, 1), lambda i: (i, 0)),
        compiler_params=pltpu.CompilerParams(
            dimension_semantics=("parallel",),
            vmem_limit_bytes=40 << 20,   # explicit: > v5e's 16 MiB default,
        ),                               # well inside v7x's 64 MiB physical
    )(*inputs)

    # Final reduction: negate once, multiply by the constant 1/N.
    return -jnp.sum(per_row[:, 0]) * (1.0 / n)


def _reference(pred, target, label_smoothing, weight=None):
    n, c = pred.shape
    logp = jax.nn.log_softmax(pred.astype(jnp.float32), axis=1)
    onehot = jax.nn.one_hot(target, c, dtype=jnp.float32)
    soft = onehot * (1.0 - label_smoothing) + label_smoothing / c
    if weight is not None:
        soft = soft * jnp.asarray(weight, jnp.float32).reshape(1, c)
    return jnp.mean(jnp.sum(-soft * logp, axis=1))


if __name__ == "__main__":
    key = jax.random.PRNGKey(0)
    kp, kt, kw = jax.random.split(key, 3)

    N, C = 8, 16
    label_smoothing = 0.1

    pred = jax.random.normal(kp, (N, C), dtype=jnp.float32)
    target = jax.random.randint(kt, (N,), 0, C, dtype=jnp.int32)
    weight = jax.random.uniform(kw, (C,), dtype=jnp.float32) + 0.5

    # 1) with per-class weight
    loss = jax.block_until_ready(
        cross_entropy_label_smooth(pred, target, label_smoothing, weight))
    ref = _reference(pred, target, label_smoothing, weight)
    assert jnp.allclose(loss, ref, atol=1e-5, rtol=1e-5), (loss, ref)

    # 2) weight=None path (PyTorch default) — no weight rows, single reduction
    loss_nw = jax.block_until_ready(
        cross_entropy_label_smooth(pred, target, label_smoothing, None))
    ref_nw = _reference(pred, target, label_smoothing, None)
    assert jnp.allclose(loss_nw, ref_nw, atol=1e-5, rtol=1e-5), (loss_nw, ref_nw)

    # 3) batch not a multiple of the row tile -> ragged last block, NO padding
    N2 = 10
    pred2 = jax.random.normal(kp, (N2, C), dtype=jnp.float32)
    target2 = jax.random.randint(kt, (N2,), 0, C, dtype=jnp.int32)
    loss_rag = jax.block_until_ready(
        cross_entropy_label_smooth(pred2, target2, label_smoothing, weight,
                                   block_rows=8))
    ref_rag = _reference(pred2, target2, label_smoothing, weight)
    assert jnp.allclose(loss_rag, ref_rag, atol=1e-5, rtol=1e-5), (loss_rag, ref_rag)

    # 4) bf16 input stays bf16 through HBM; cast happens in-kernel
    pred_bf16 = pred.astype(jnp.bfloat16)
    loss_bf = jax.block_until_ready(
        cross_entropy_label_smooth(pred_bf16, target, label_smoothing, weight))
    ref_bf = _reference(pred_bf16, target, label_smoothing, weight)
    assert jnp.allclose(loss_bf, ref_bf, atol=1e-4, rtol=1e-4), (loss_bf, ref_bf)

    print("KERNEL_OK")
</pallas_src>

<mosaic_0001>
module attributes {stable_mosaic.version = 11 : i64} {
  func.func @_ce_label_smooth_kernel(%arg0: i32, %arg1: memref<1x16xi32, #tpu.memory_space<vmem>>, %arg2: memref<1x16xf32, #tpu.memory_space<vmem>>, %arg3: memref<1x16xf32, #tpu.memory_space<vmem>>, %arg4: memref<8x16xf32, #tpu.memory_space<vmem>>, %arg5: memref<8x1xi32, #tpu.memory_space<vmem>>, %arg6: memref<8x1xf32, #tpu.memory_space<vmem>>) attributes {dimension_semantics = [#tpu.dimension_semantics<parallel>], iteration_bounds = array<i64: 1>, scalar_prefetch = 0 : i64, scratch_operands = 0 : i64, tpu.core_type = #tpu.core_type<tc>, window_params = [{pipeline_mode = #tpu.pipeline_mode<synchronous>, transform_indices = @transform_0, window_bounds = array<i64: 1, 16>}, {pipeline_mode = #tpu.pipeline_mode<synchronous>, transform_indices = @transform_1, window_bounds = array<i64: 1, 16>}, {pipeline_mode = #tpu.pipeline_mode<synchronous>, transform_indices = @transform_2, window_bounds = array<i64: 1, 16>}, {transform_indices = @transform_3, window_bounds = array<i64: 8, 16>}, {transform_indices = @transform_4, window_bounds = array<i64: 8, 1>}, {transform_indices = @transform_5, window_bounds = array<i64: 8, 1>}]} {
    %c0 = arith.constant 0 : index
    %c0_0 = arith.constant 0 : index
    %0 = vector.load %arg2[%c0, %c0_0] : memref<1x16xf32, #tpu.memory_space<vmem>>, vector<1x16xf32>
    %c0_1 = arith.constant 0 : index
    %c0_2 = arith.constant 0 : index
    %1 = vector.load %arg3[%c0_1, %c0_2] : memref<1x16xf32, #tpu.memory_space<vmem>>, vector<1x16xf32>
    %c0_3 = arith.constant 0 : index
    %c0_4 = arith.constant 0 : index
    %2 = vector.load %arg4[%c0_3, %c0_4] : memref<8x16xf32, #tpu.memory_space<vmem>>, vector<8x16xf32>
    %cst = arith.constant dense<0xFF800000> : vector<8xf32>
    %3 = vector.multi_reduction <maximumf>, %2, %cst [1] : vector<8x16xf32> to vector<8xf32>
    %4 = vector.shape_cast %3 : vector<8xf32> to vector<8x1xf32>
    %5 = vector.broadcast %4 : vector<8x1xf32> to vector<8x16xf32>
    %6 = arith.subf %2, %5 : vector<8x16xf32>
    %7 = math.exp %6 : vector<8x16xf32>
    %cst_5 = arith.constant dense<0.000000e+00> : vector<8xf32>
    %8 = vector.multi_reduction <add>, %7, %cst_5 [1] : vector<8x16xf32> to vector<8xf32>
    %9 = vector.shape_cast %8 : vector<8xf32> to vector<8x1xf32>
    %10 = math.log %9 : vector<8x1xf32>
    %c0_6 = arith.constant 0 : index
    %c0_7 = arith.constant 0 : index
    %11 = vector.load %arg1[%c0_6, %c0_7] : memref<1x16xi32, #tpu.memory_space<vmem>>, vector<1x16xi32>
    %c0_8 = arith.constant 0 : index
    %c0_9 = arith.constant 0 : index
    %12 = vector.load %arg5[%c0_8, %c0_9] : memref<8x1xi32, #tpu.memory_space<vmem>>, vector<8x1xi32>
    %13 = vector.broadcast %11 : vector<1x16xi32> to vector<8x16xi32>
    %14 = vector.broadcast %12 : vector<8x1xi32> to vector<8x16xi32>
    %15 = arith.cmpi eq, %13, %14 : vector<8x16xi32>
    %16 = vector.shape_cast %1 : vector<1x16xf32> to vector<1x16xf32>
    %17 = vector.broadcast %16 : vector<1x16xf32> to vector<8x16xf32>
    %18 = vector.shape_cast %0 : vector<1x16xf32> to vector<1x16xf32>
    %19 = vector.broadcast %18 : vector<1x16xf32> to vector<8x16xf32>
    %20 = arith.select %15, %17, %19 : vector<8x16xi1>, vector<8x16xf32>
    %21 = arith.mulf %20, %6 : vector<8x16xf32>
    %cst_10 = arith.constant dense<0.000000e+00> : vector<8xf32>
    %22 = vector.multi_reduction <add>, %21, %cst_10 [1] : vector<8x16xf32> to vector<8xf32>
    %23 = vector.shape_cast %22 : vector<8xf32> to vector<8x1xf32>
    %cst_11 = arith.constant dense<0.000000e+00> : vector<8xf32>
    %24 = vector.multi_reduction <add>, %20, %cst_11 [1] : vector<8x16xf32> to vector<8xf32>
    %25 = vector.shape_cast %24 : vector<8xf32> to vector<8x1xf32>
    %26 = arith.mulf %10, %25 : vector<8x1xf32>
    %27 = arith.subf %23, %26 : vector<8x1xf32>
    %c0_12 = arith.constant 0 : index
    %c0_13 = arith.constant 0 : index
    %28 = vector.load %arg6[%c0_12, %c0_13] : memref<8x1xf32, #tpu.memory_space<vmem>>, vector<8x1xf32>
    tpu.vector_store %arg6[%c0_12, %c0_13], %27 {strides = array<i32>} : memref<8x1xf32, #tpu.memory_space<vmem>>, vector<8x1xf32>,
    return
  }
  func.func @transform_0(%arg0: i32) -> (i32, i32) {
    %c0_i32 = arith.constant 0 : i32
    %c0_i32_0 = arith.constant 0 : i32
    %c0_i32_1 = arith.constant 0 : i32
    return %c0_i32, %c0_i32_0 : i32, i32
  }
  func.func @transform_1(%arg0: i32) -> (i32, i32) {
    %c0_i32 = arith.constant 0 : i32
    %c0_i32_0 = arith.constant 0 : i32
    %c0_i32_1 = arith.constant 0 : i32
    return %c0_i32, %c0_i32_0 : i32, i32
  }
  func.func @transform_2(%arg0: i32) -> (i32, i32) {
    %c0_i32 = arith.constant 0 : i32
    %c0_i32_0 = arith.constant 0 : i32
    %c0_i32_1 = arith.constant 0 : i32
    return %c0_i32, %c0_i32_0 : i32, i32
  }
  func.func @transform_3(%arg0: i32) -> (i32, i32) {
    %c0_i32 = arith.constant 0 : i32
    %c0_i32_0 = arith.constant 0 : i32
    return %arg0, %c0_i32 : i32, i32
  }
  func.func @transform_4(%arg0: i32) -> (i32, i32) {
    %c0_i32 = arith.constant 0 : i32
    %c0_i32_0 = arith.constant 0 : i32
    return %arg0, %c0_i32 : i32, i32
  }
  func.func @transform_5(%arg0: i32) -> (i32, i32) {
    %c0_i32 = arith.constant 0 : i32
    %c0_i32_0 = arith.constant 0 : i32
    return %arg0, %c0_i32 : i32, i32
  }
}

</mosaic_0001>

<bundles_post_ra>
// kernel: tpu_custom_call.1
= control target key start
LH: loop header
LB: loop body
LE: loop exit
PB: predicated region body
PF: predicated region fallthrough
CT: control target
= control target key end

     0   :  { %vm23_vm0 = vcmask 130048   ;;  %v82_v1 = vmov 0   ;;  %vm67_vm2 = vcmask 7168   ;;  %s135_s3 = inlined_call_operand.vmem [shape: f32[8,16], index: 3, kind: input, shape index: {}]   ;;  %s136_s4 = inlined_call_operand.vmem [shape: s32[8,1], index: 4, kind: input, shape index: {}]   ;;  %s137_s0 = inlined_call_operand.vmem [shape: s32[1,16], index: 0, kind: input, shape index: {}]   ;;  %s138_s1 = inlined_call_operand.vmem [shape: f32[1,16], index: 1, kind: input, shape index: {}]   ;;  %s139_s2 = inlined_call_operand.vmem [shape: f32[1,16], index: 2, kind: input, shape index: {}]   ;;  %s140_s5 = inlined_call_operand.vmem [shape: f32[8,1], index: 5, kind: output, shape index: {}]  }
   0x1   :  { %v22_v0 = vld [vmem:[%s135_s3] sm:$0xff]  ;;  %77 = vset.pattern.permute.xlu0 %v82_v1 }
   0x2   :  { %v24_v2 = vsel %vm23_vm0, %v22_v0, -inf  ;;  %v36_v3 = vld [vmem:[%s136_s4] sm:$0xff] }
   0x3   :  { %25 = vmax.xlane.f32.xlu0 %v24_v2  ;;  %v73_v8 = vld [vmem:[%s137_s0] ss:$0 sm:$0xff] }
   0x4   :  { %v75_v9 = vld [vmem:[%s138_s1] ss:$0 sm:$0xff] }
   0x5   :  { %v74_v10 = vld [vmem:[%s139_s2] ss:$0 sm:$0xff] }
  0x19   :  { %42 = vperm.xlu0 %77, %v36_v3  }
  0x8c   :  { %v26_v4 = vpop.xlane.xlu0 %25 }
  0x8d   :  { %v27_v5 = vsub.f32 %v22_v0, %v26_v4 }
  0x8f   :  { %v28_v6 = vmul.f32 1.442695, %v27_v5 }
  0x91   :  { %78 = vpow2.f32 %v28_v6 }
  0x94   :  { %v43_v7 = vpop.permute.xlu0 %42 }
  0x95   :  { %vm44_vm1 = vcmp.eq.s32.totalorder %v73_v8, %v43_v7 }
  0x96   :  { %v57_v13 = vsel %vm44_vm1, %v74_v10, %v75_v9 }
  0x97   :  { %v62_v14 = vsel %vm23_vm0, %v57_v13, 0.0  ;;  %v58_v15 = vmul.f32 %v57_v13, %v27_v5 }
  0x99   :  { %v59_v16 = vsel %vm23_vm0, %v58_v15, 0.0 }
  0x9e   :  { %v79_v11 = vpop.eup %78 }
  0x9f   :  { %v30_v12 = vsel %vm23_vm0, %v79_v11, 0.0 }
  0xa0   :  { %31 = vadd.xlane.f32.xlu1 %v30_v12 }
  0xa4   :  { %63 = vadd.xlane.f32.xlu1 %v62_v14 }
  0xa8   :  { %60 = vadd.xlane.f32.xlu1 %v59_v16 }
 0x129   :  { %v32_v17 = vpop.xlane.xlu1 %31 }
 0x12a   :  { %80 = vlog2.f32 %v32_v17 }
 0x12d   :  { %v64_v18 = vpop.xlane.xlu1 %63 }
 0x131   :  { %v61_v22 = vpop.xlane.xlu1 %60 }
 0x137   :  { %v81_v19 = vpop.eup %80 }
 0x138   :  { %v34_v20 = vmul.f32 0.6931472, %v81_v19 }
 0x13a   :  { %v65_v21 = vmul.f32 %v64_v18, %v34_v20 }
 0x13c   :  { %v66_v23 = vsub.f32 %v61_v22, %v65_v21 }
 0x13e   :  { %68 = vst.msk [vmem:[%s140_s5] sm:$0xff] %vm67_vm2, %v66_v23 }

</bundles_post_ra>
